<compile_context>
chip_gen: v7x
topology: tpu7x:2x2x1
jax: 0.10.0
libtpu: 0.0.40
codegen_flags: <defaults>
</compile_context>

<pallas_src>
import functools

import jax
import jax.numpy as jnp
from jax.experimental import pallas as pl
from jax.experimental.pallas import tpu as pltpu


def _channel_attention_kernel(x_ref, w1_ref, w2t_ref, o_ref,
                              sum_sc, max_sc, *, hw_total):
    # x_ref:   (Bb, C, HW_TILE)  one batch block x one spatial tile
    # w1_ref:  (Cr, C)           first 1x1 conv weight (native PyTorch layout)
    # w2t_ref: (Cr, C)           second 1x1 conv weight, transposed
    # o_ref:   (Bb, 1, C)        sigmoid(MLP(avg) + MLP(max)) per batch block
    # sum_sc:  (Bb, C) f32       running spatial sum
    # max_sc:  (Bb, C) f32       running spatial max
    k = pl.program_id(1)

    @pl.when(k == 0)
    def _():
        sum_sc[...] = jnp.zeros_like(sum_sc)
        max_sc[...] = jnp.full_like(max_sc, -jnp.inf)

    x = x_ref[...]  # native dtype; no full-size f32 temp
    sum_sc[...] += jnp.sum(x, axis=-1, dtype=jnp.float32)
    max_sc[...] = jnp.maximum(max_sc[...], jnp.max(x, axis=-1).astype(jnp.float32))

    @pl.when(k == pl.num_programs(1) - 1)
    def _():
        bb = o_ref.shape[0]
        avg = sum_sc[...] * jnp.float32(1.0 / hw_total)        # (Bb, C)
        mx = max_sc[...]                                       # (Bb, C)
        pooled = jnp.concatenate([avg, mx], axis=0)            # (2*Bb, C)

        # shared MLP: Conv2d(C, C//r, 1) -> ReLU -> Conv2d(C//r, C, 1)
        # layer 1: contract C of pooled against C of (Cr, C) weight (lane-dense).
        h = jax.lax.dot_general(
            pooled, w1_ref[...],
            dimension_numbers=(((1,), (1,)), ((), ())),
            preferred_element_type=jnp.float32)                # (2*Bb, Cr)
        h = jnp.maximum(h, 0.0)
        y = jnp.dot(h, w2t_ref[...],
                    preferred_element_type=jnp.float32)        # (2*Bb, C)

        out = jax.nn.sigmoid(y[:bb] + y[bb:])                  # (Bb, C)
        o_ref[...] = out[:, None, :].astype(o_ref.dtype)       # (Bb, 1, C)


def _choose_block_sizes(B, C, HW, itemsize):
    """Pick (batch block, spatial tile) so blocks divide exactly and stay a few MiB."""
    # Spatial tile: lane axis must be a multiple of 128 or the full extent.
    if HW % 128 == 0:
        hw_tile = min(HW, 2048)
        while HW % hw_tile != 0:      # keep tiles exact -> no ragged-tile masking
            hw_tile -= 128
    else:
        hw_tile = HW                  # single full-extent spatial tile

    # Batch block: target a few MiB per input block (safe for v7x's 64 MiB VMEM
    # with double-buffering), while keeping >=2 blocks on the parallel batch
    # axis when possible so v7x's two TensorCores both get work.
    per_b = C * hw_tile * itemsize
    target = 4 * 1024 * 1024
    bb = max(1, min(B, target // max(per_b, 1)))
    while bb > 1 and (B % bb != 0 or B // bb < 2):
        bb -= 1
    return bb, hw_tile


def channel_attention(x, w1, w2):
    """x: (B, C, H, W) NCHW; w1: (C//r, C); w2: (C, C//r).  Returns (B, C, 1, 1)."""
    B, C, H, W = x.shape
    Cr = w1.shape[0]
    HW = H * W

    x_flat = x.reshape(B, C, HW)
    w2t = w2.T  # (Cr, C) — lane-dense weight tile

    bb, hw_tile = _choose_block_sizes(B, C, HW, x.dtype.itemsize)
    grid = (B // bb, HW // hw_tile)

    kernel = functools.partial(_channel_attention_kernel, hw_total=HW)

    out = pl.pallas_call(
        kernel,
        out_shape=jax.ShapeDtypeStruct((B, 1, C), x.dtype),
        grid_spec=pltpu.PrefetchScalarGridSpec(
            num_scalar_prefetch=0,
            grid=grid,
            in_specs=[
                pl.BlockSpec((bb, C, hw_tile), lambda b, k: (b, 0, k)),
                pl.BlockSpec((Cr, C), lambda b, k: (0, 0)),   # resident weights
                pl.BlockSpec((Cr, C), lambda b, k: (0, 0)),
            ],
            out_specs=pl.BlockSpec((bb, 1, C), lambda b, k: (b, 0, 0)),
            scratch_shapes=[
                pltpu.VMEM((bb, C), jnp.float32),   # running sum
                pltpu.VMEM((bb, C), jnp.float32),   # running max
            ],
        ),
        compiler_params=pltpu.CompilerParams(
            dimension_semantics=("parallel", "arbitrary"),
            vmem_limit_bytes=32 * 1024 * 1024,
        ),
    )(x_flat, w1, w2t)

    return out.reshape(B, C, 1, 1)


def _reference(x, w1, w2):
    # Pure-JAX reference of the PyTorch forward, for a correctness check.
    avg = jnp.mean(x, axis=(2, 3))                      # (B, C)
    mx = jnp.max(x, axis=(2, 3))                        # (B, C)

    def mlp(v):
        h = jnp.maximum(v @ w1.T, 0.0)                  # (B, C//r)
        return h @ w2.T                                  # (B, C)

    out = jax.nn.sigmoid(mlp(avg) + mlp(mx))            # (B, C)
    return out[:, :, None, None]


if __name__ == "__main__":
    # Module config: channel=64, ratio=16 -> hidden = 4
    B, C, H, W = 2, 64, 16, 16
    ratio = 16
    Cr = C // ratio

    key = jax.random.PRNGKey(0)
    kx, k1, k2 = jax.random.split(key, 3)

    x = jax.random.normal(kx, (B, C, H, W), dtype=jnp.float32)
    # Conv2d(channel, channel//ratio, 1, bias=False) weight: (Cr, C, 1, 1) -> (Cr, C)
    w1 = jax.random.normal(k1, (Cr, C), dtype=jnp.float32) * (1.0 / jnp.sqrt(C))
    # Conv2d(channel//ratio, channel, 1, bias=False) weight: (C, Cr, 1, 1) -> (C, Cr)
    w2 = jax.random.normal(k2, (C, Cr), dtype=jnp.float32) * (1.0 / jnp.sqrt(Cr))

    out = channel_attention(x, w1, w2)
    out = jax.block_until_ready(out)

    ref = _reference(x, w1, w2)
    assert out.shape == (B, C, 1, 1)
    assert jnp.allclose(out, ref, atol=1e-5, rtol=1e-5), "mismatch vs reference"

    print("KERNEL_OK")
</pallas_src>

<mosaic_0001>
module attributes {stable_mosaic.version = 11 : i64} {
  func.func @_channel_attention_kernel(%arg0: i32, %arg1: i32, %arg2: memref<1x64x256xf32, #tpu.memory_space<vmem>>, %arg3: memref<4x64xf32, #tpu.memory_space<vmem>>, %arg4: memref<4x64xf32, #tpu.memory_space<vmem>>, %arg5: memref<1x1x64xf32, #tpu.memory_space<vmem>>, %arg6: memref<1x64xf32, #tpu.memory_space<vmem>>, %arg7: memref<1x64xf32, #tpu.memory_space<vmem>>) attributes {dimension_semantics = [#tpu.dimension_semantics<parallel>, #tpu.dimension_semantics<arbitrary>], iteration_bounds = array<i64: 2, 1>, scalar_prefetch = 0 : i64, scratch_operands = 2 : i64, tpu.core_type = #tpu.core_type<tc>, window_params = [{transform_indices = @transform_0, window_bounds = array<i64: 1, 64, 256>}, {pipeline_mode = #tpu.pipeline_mode<synchronous>, transform_indices = @transform_1, window_bounds = array<i64: 4, 64>}, {pipeline_mode = #tpu.pipeline_mode<synchronous>, transform_indices = @transform_2, window_bounds = array<i64: 4, 64>}, {transform_indices = @transform_3, window_bounds = array<i64: 1, 1, 64>}]} {
    %c0_i32 = arith.constant 0 : i32
    %0 = arith.cmpi eq, %arg1, %c0_i32 : i32
    %1 = arith.extui %0 : i1 to i32
    %c0_i32_0 = arith.constant 0 : i32
    %2 = arith.cmpi ne, %1, %c0_i32_0 : i32
    scf.if %2 {
      %cst_14 = arith.constant 0.000000e+00 : f32
      %15 = vector.broadcast %cst_14 : f32 to vector<1x64xf32>
      %c0_15 = arith.constant 0 : index
      %c0_16 = arith.constant 0 : index
      %16 = vector.load %arg6[%c0_15, %c0_16] : memref<1x64xf32, #tpu.memory_space<vmem>>, vector<1x64xf32>
      tpu.vector_store %arg6[%c0_15, %c0_16], %15 {strides = array<i32>} : memref<1x64xf32, #tpu.memory_space<vmem>>, vector<1x64xf32>,
      %cst_17 = arith.constant 0xFF800000 : f32
      %17 = vector.broadcast %cst_17 : f32 to vector<1x64xf32>
      %c0_18 = arith.constant 0 : index
      %c0_19 = arith.constant 0 : index
      %18 = vector.load %arg7[%c0_18, %c0_19] : memref<1x64xf32, #tpu.memory_space<vmem>>, vector<1x64xf32>
      tpu.vector_store %arg7[%c0_18, %c0_19], %17 {strides = array<i32>} : memref<1x64xf32, #tpu.memory_space<vmem>>, vector<1x64xf32>,
    } else {
    }
    %c0 = arith.constant 0 : index
    %c0_1 = arith.constant 0 : index
    %c0_2 = arith.constant 0 : index
    %3 = vector.load %arg2[%c0, %c0_1, %c0_2] : memref<1x64x256xf32, #tpu.memory_space<vmem>>, vector<1x64x256xf32>
    %c0_3 = arith.constant 0 : index
    %c0_4 = arith.constant 0 : index
    %4 = vector.load %arg6[%c0_3, %c0_4] : memref<1x64xf32, #tpu.memory_space<vmem>>, vector<1x64xf32>
    %cst = arith.constant dense<0.000000e+00> : vector<1x64xf32>
    %5 = vector.multi_reduction <add>, %3, %cst [2] : vector<1x64x256xf32> to vector<1x64xf32>
    %6 = arith.addf %4, %5 : vector<1x64xf32>
    %c0_5 = arith.constant 0 : index
    %c0_6 = arith.constant 0 : index
    %7 = vector.load %arg6[%c0_5, %c0_6] : memref<1x64xf32, #tpu.memory_space<vmem>>, vector<1x64xf32>
    tpu.vector_store %arg6[%c0_5, %c0_6], %6 {strides = array<i32>} : memref<1x64xf32, #tpu.memory_space<vmem>>, vector<1x64xf32>,
    %c0_7 = arith.constant 0 : index
    %c0_8 = arith.constant 0 : index
    %8 = vector.load %arg7[%c0_7, %c0_8] : memref<1x64xf32, #tpu.memory_space<vmem>>, vector<1x64xf32>
    %cst_9 = arith.constant dense<0xFF800000> : vector<1x64xf32>
    %9 = vector.multi_reduction <maximumf>, %3, %cst_9 [2] : vector<1x64x256xf32> to vector<1x64xf32>
    %10 = arith.maximumf %8, %9 : vector<1x64xf32>
    %c0_10 = arith.constant 0 : index
    %c0_11 = arith.constant 0 : index
    %11 = vector.load %arg7[%c0_10, %c0_11] : memref<1x64xf32, #tpu.memory_space<vmem>>, vector<1x64xf32>
    tpu.vector_store %arg7[%c0_10, %c0_11], %10 {strides = array<i32>} : memref<1x64xf32, #tpu.memory_space<vmem>>, vector<1x64xf32>,
    %c0_i32_12 = arith.constant 0 : i32
    %12 = arith.cmpi eq, %arg1, %c0_i32_12 : i32
    %13 = arith.extui %12 : i1 to i32
    %c0_i32_13 = arith.constant 0 : i32
    %14 = arith.cmpi ne, %13, %c0_i32_13 : i32
    scf.if %14 {
      %c0_14 = arith.constant 0 : index
      %c0_15 = arith.constant 0 : index
      %15 = vector.load %arg6[%c0_14, %c0_15] : memref<1x64xf32, #tpu.memory_space<vmem>>, vector<1x64xf32>
      %cst_16 = arith.constant 3.906250e-03 : f32
      %16 = vector.broadcast %cst_16 : f32 to vector<1x64xf32>
      %17 = arith.mulf %15, %16 : vector<1x64xf32>
      %c0_17 = arith.constant 0 : index
      %c0_18 = arith.constant 0 : index
      %18 = vector.load %arg7[%c0_17, %c0_18] : memref<1x64xf32, #tpu.memory_space<vmem>>, vector<1x64xf32>
      %19 = tpu.concatenate %17, %18 in 0 : vector<1x64xf32>, vector<1x64xf32> -> vector<2x64xf32>
      %c0_19 = arith.constant 0 : index
      %c0_20 = arith.constant 0 : index
      %20 = vector.load %arg3[%c0_19, %c0_20] : memref<4x64xf32, #tpu.memory_space<vmem>>, vector<4x64xf32>
      %cst_21 = arith.constant dense<0.000000e+00> : vector<2x4xf32>
      %21 = tpu.matmul %19, %20, %cst_21 {dimension_numbers = #tpu.dot_dimension_numbers<[1], [1], [0], [0], [0, 0, 1, 0], [], []>} : vector<2x64xf32>, vector<4x64xf32>, vector<2x4xf32> -> vector<2x4xf32>
      %cst_22 = arith.constant 0.000000e+00 : f32
      %22 = vector.broadcast %cst_22 : f32 to vector<2x4xf32>
      %23 = arith.maximumf %21, %22 : vector<2x4xf32>
      %c0_23 = arith.constant 0 : index
      %c0_24 = arith.constant 0 : index
      %24 = vector.load %arg4[%c0_23, %c0_24] : memref<4x64xf32, #tpu.memory_space<vmem>>, vector<4x64xf32>
      %cst_25 = arith.constant dense<0.000000e+00> : vector<2x64xf32>
      %25 = tpu.matmul %23, %24, %cst_25 {dimension_numbers = #tpu.dot_dimension_numbers<[1], [0], [0], [1], [0, 0, 1, 1], [], []>} : vector<2x4xf32>, vector<4x64xf32>, vector<2x64xf32> -> vector<2x64xf32>
      %26 = vector.extract_strided_slice %25 {offsets = [0, 0], sizes = [1, 64], strides = [1, 1]} : vector<2x64xf32> to vector<1x64xf32>
      %27 = vector.extract_strided_slice %25 {offsets = [1, 0], sizes = [1, 64], strides = [1, 1]} : vector<2x64xf32> to vector<1x64xf32>
      %28 = arith.addf %26, %27 : vector<1x64xf32>
      %29 = arith.negf %28 : vector<1x64xf32>
      %30 = math.exp %29 : vector<1x64xf32>
      %cst_26 = arith.constant 1.000000e+00 : f32
      %31 = vector.broadcast %cst_26 : f32 to vector<1x64xf32>
      %32 = arith.addf %31, %30 : vector<1x64xf32>
      %33 = arith.divf %31, %32 : vector<1x64xf32>
      %34 = vector.shape_cast %33 : vector<1x64xf32> to vector<1x1x64xf32>
      %c0_27 = arith.constant 0 : index
      %c0_28 = arith.constant 0 : index
      %c0_29 = arith.constant 0 : index
      %35 = vector.load %arg5[%c0_27, %c0_28, %c0_29] : memref<1x1x64xf32, #tpu.memory_space<vmem>>, vector<1x1x64xf32>
      tpu.vector_store %arg5[%c0_27, %c0_28, %c0_29], %34 {strides = array<i32>} : memref<1x1x64xf32, #tpu.memory_space<vmem>>, vector<1x1x64xf32>,
    } else {
    }
    return
  }
  func.func @transform_0(%arg0: i32, %arg1: i32) -> (i32, i32, i32) {
    %c0_i32 = arith.constant 0 : i32
    %c0_i32_0 = arith.constant 0 : i32
    return %arg0, %c0_i32, %arg1 : i32, i32, i32
  }
  func.func @transform_1(%arg0: i32, %arg1: i32) -> (i32, i32) {
    %c0_i32 = arith.constant 0 : i32
    %c0_i32_0 = arith.constant 0 : i32
    %c0_i32_1 = arith.constant 0 : i32
    return %c0_i32, %c0_i32_0 : i32, i32
  }
  func.func @transform_2(%arg0: i32, %arg1: i32) -> (i32, i32) {
    %c0_i32 = arith.constant 0 : i32
    %c0_i32_0 = arith.constant 0 : i32
    %c0_i32_1 = arith.constant 0 : i32
    return %c0_i32, %c0_i32_0 : i32, i32
  }
  func.func @transform_3(%arg0: i32, %arg1: i32) -> (i32, i32, i32) {
    %c0_i32 = arith.constant 0 : i32
    %c0_i32_0 = arith.constant 0 : i32
    %c0_i32_1 = arith.constant 0 : i32
    return %arg0, %c0_i32, %c0_i32_0 : i32, i32, i32
  }
}

</mosaic_0001>

<bundles_post_ra>
// kernel: tpu_custom_call.1
= control target key start
LH: loop header
LB: loop body
LE: loop exit
PB: predicated region body
PF: predicated region fallthrough
CT: control target
= control target key end

     0   :  { %8 = vsyncpa [#allocation5], 0  ;;  %s2919_s0 = inlined_call_operand.hbm [shape: f32[2,64,256], index: 0, kind: input, shape index: {}]   ;;  %s2920_s1 = inlined_call_operand.hbm [shape: f32[4,64], index: 1, kind: input, shape index: {}]   ;;  %s2921_s2 = inlined_call_operand.vmem [shape: f32[4,64], index: 2, kind: input, shape index: {}]   ;;  %s2922_s3 = inlined_call_operand.hbm [shape: f32[2,1,64], index: 3, kind: output, shape index: {}]  }
   0x1   :  { %10 = vsyncpa [#allocation5 + $0x1], 0 }
   0x2   :  { %11 = vsyncpa [#allocation8], 0 }
   0x3   :  { %12 = vsyncpa [#allocation6], 0 }
   0x4   :  { %14 = vsyncpa [#allocation6 + $0x1], 0  ;;  %s2360_s12 = smov 0   ;;  %s2362_s13 = smov 0  }
   0x5   :  { %s2364_s14 = smov 0   ;;  %s2366_s15 = smov 0  }
   0x6   :  { %s2368_s16 = smov 0   ;;  %s2370_s17 = smov 0  }
   0x7 LB: > { %s2063_s18 = sadd.s32 4294967295, %s2328_s17   ;;  %s2064_s19 = sadd.s32 4294967294, %s2328_s17   ;;  %s2328_s17 = sphi %s2370_s17, %s20_s17   ;;  %s2324_s16 = sphi %s2368_s16, %s2950_s16   ;;  %s2320_s15 = sphi %s2366_s15, %s2949_s15   ;;  %s2316_s14 = sphi %s2364_s14, %s2948_s14   ;;  %s2312_s13 = sphi %s2362_s13, %s2947_s13   ;;  %s2308_s12 = sphi %s2360_s12, %s2946_s12  }
   0x8   : > { %s41_s20 = sadd.s32 1, %s2316_s14  ;;  %p48_p0 = scmp.ne.s32.totalorder %s2316_s14, %s2312_s13 }
   0x9   : > { %p49_p1 = scmp.eq.s32.totalorder %s2328_s17, 0  ;;  %p54_p2 = scmp.ne.s32.totalorder %s2312_s13, %s2308_s12 }
   0xa   : > { %p2398_p3 = scmp.eq.s32.totalorder %s2063_s18, 0  ;;  %p120_p4 = scmp.eq.s32.totalorder %s2063_s18, 1 }
   0xb   : > { %p2402_p5 = por %p49_p1, %p48_p0  ;;  %p126_p6 = scmp.eq.s32.totalorder %s2064_s19, 1 }
   0xc   : > { %s2929_s21 = scalar_select %p2398_p3, 1, 0 }
   0xd   : > { %p2408_p7 = por %p2398_p3, %p54_p2  ;;  %p2412_p8 = por %p120_p4, %p48_p0 }
   0xe   : > { %p2416_p9 = por %p126_p6, %p54_p2  ;;  %p2065_p10 = scmp.ge.s32.totalorder %s2328_s17, 1 }
   0xf   : > { %s2931_s23 = scalar_select %p2408_p7, 1, 0 }
  0x10   : > { %s2932_s24 = scalar_select %p2412_p8, 1, 0 }
  0x11   : > { %s2933_s25 = scalar_select %p2416_p9, 1, 0 }
  0x12   : > { %p133_p11 = scmp.lt.s32.totalorder %s2328_s17, 3  ;;  %s2330_s27 = smov [#allocation7]  }
  0x13   : > { %s146_s28 = sshll.u32 %s2330_s27, 4  ;;  %p2119_p1 = scmp.lt.s32.totalorder %s2328_s17, 2  ;;  %s147_s28 = int_to_ptr.vmem [resolvable:$true] %s146_s28 }
  0x14   : > { %p2423_p13 = pnand %p2065_p10, %p133_p11  ;;  %s32_s4 = sadd.s32 1, %s2324_s16 }
  0x15   : > { %p2432_p4 = pnand %p2119_p1, %p2402_p5  ;;  %p2443_p6 = scmp.ge.s32.totalorder %s32_s4, 2 }
  0x16   : > { %s2934_s26 = scalar_select %p2423_p13, 1, 0 }
  0x17   : > { %p2106_p0 = pneg %p2423_p13  ;;  %s160_s6 = sand.u32 1, %s2316_s14  }
  0x18   : > { %s2935_s29 = scalar_select %p2432_p4, 1, 0 }
  0x19   : > { %p2438_p2 = pnand %p2106_p0, %p2398_p3  ;;  %s2184_s9 = scalar_lea.hbm %s2920_s1, 64 }
  0x1a   : > { %s2937_s5 = scalar_select %p2443_p6, 1, 0 }
  0x1b   : > { %p2185_p5 = scmp.ne.s32.totalorder %s2920_s1, %s2184_s9  ;;  %p2186_p10 = pneg %p2438_p2 }
  0x1c   : > { %p2191_p0 = scmp.lt.u32.totalorder %s2184_s9, %s2920_s1 }
  0x1d   : > { %p2187_p11 = pnand %p2186_p10, %p2185_p5 }
  0x1f   : > { %p2188_p1 = pneg %p2187_p11 }
  0x21   : > { %p2193_p12 = pnand %p2191_p0, %p2188_p1 }
  0x23   : > { %2196 = shalt.err (!%p2193_p12)
}
  0x24   : > { %s2197_s22 = scalar_lea.vmem %s147_s28, 64  ;;  %p2205_p7 = scmp.lt.s32.totalorder %s147_s28, %s147_s28 }
  0x25   : > { %p2198_p9 = scmp.ne.s32.totalorder %s147_s28, %s2197_s22  ;;  %p2206_p13 = scmp.lt.s32.totalorder %s2197_s22, %s2197_s22 }
  0x27   : > { %p2200_p8 = pnand %p2198_p9, %p2186_p10  ;;  %p2207_p4 = por %p2206_p13, %p2205_p7 }
  0x29   : > { %p2201_p3 = pneg %p2200_p8 }
  0x2b   : > { %p2208_p6 = pnand %p2207_p4, %p2201_p3 }
  0x2d   : > { %2211 = shalt.err (!%p2208_p6)
}
  0x2e   : > { %2109 = dma.hbm_to_vmem [thread:$0]  (!%p2438_p2), %s2920_s1, 64, %s147_s28, [#allocation8]  }
  0x2f   : > { %p2938_p9 = scmp.ne.s32.totalorder %s2937_s5, 0  ;;  %s2068_s8 = sshll.u32 %s160_s6, 7 }
  0x30   : > { %s2083_s10 = sshll.u32 %s2324_s16, 11  ;;  %s164_s19 = scalar_lea.vmem [#allocation4], %s2068_s8 }
  0x31   : > { %s2952_s4 = smov (%p2938_p9, %s32_s4), 0  ;;  %s2474_s18 = scalar_lea.hbm %s2919_s0, %s2083_s10 }
  0x32   : > { %s36_s9 = ssub.s32 %s2324_s16, %s2952_s4  ;;  %s173_s22 = sshll.u32 %s164_s19, 4  ;;  %s2481_s22 = int_to_ptr.vmem [resolvable:$true] %s173_s22 }
  0x33   : > { %p39_p3 = scmp.eq.s32.totalorder %s36_s9, 0  ;;  %s2483_s5 = scalar_lea.sflag [#allocation5], %s160_s6 }
  0x34   : > { %s2212_s27 = scalar_lea.hbm %s2474_s18, 2048  ;;  %p2939_p8 = scmp.ne.s32.totalorder %s2935_s29, 0 }
  0x35   : > { %s2479_s28 = scalar_select %p39_p3, %s2316_s14, %s41_s20  }
  0x36   : > { %p2213_p7 = scmp.ne.s32.totalorder %s2474_s18, %s2212_s27  ;;  %p2214_p12 = pneg %p2939_p8 }
  0x37   : > { %s2217_s8 = scalar_lea.hbm %s2919_s0, 4096  ;;  %p2218_p2 = scmp.lt.u32.totalorder %s2474_s18, %s2919_s0 }
  0x38   : > { %p2215_p13 = pnand %p2214_p12, %p2213_p7  ;;  %p2219_p6 = scmp.lt.u32.totalorder %s2217_s8, %s2212_s27 }
  0x39   : > { %p2221_p10 = scmp.lt.u32.totalorder %s2212_s27, %s2474_s18 }
  0x3a   : > { %p2216_p4 = pneg %p2215_p13  ;;  %p2220_p5 = por %p2219_p6, %p2218_p2 }
  0x3c   : > { %p2222_p11 = por %p2221_p10, %p2220_p5 }
  0x3e   : > { %p2223_p1 = pnand %p2222_p11, %p2216_p4 }
  0x40   : > { %2226 = shalt.err (!%p2223_p1)
}
  0x41   : > { %s2227_s20 = scalar_lea.vmem %s2481_s22, 2048  ;;  %s2331_s6 = smov [#allocation4]  }
  0x42   : > { %p2228_p0 = scmp.ne.s32.totalorder %s2481_s22, %s2227_s20  ;;  %s2232_s11 = sshll.u32 %s2331_s6, 4  ;;  %s2233_s11 = int_to_ptr.vmem [resolvable:$false] %s2232_s11 }
  0x43   : > { %s2234_s19 = scalar_lea.vmem %s2233_s11, 4096  ;;  %p2235_p7 = scmp.lt.s32.totalorder %s2481_s22, %s2233_s11 }
  0x44   : > { %p2230_p9 = pnand %p2228_p0, %p2214_p12  ;;  %p2236_p13 = scmp.lt.s32.totalorder %s2234_s19, %s2227_s20 }
  0x46   : > { %p2231_p3 = pneg %p2230_p9  ;;  %p2237_p2 = por %p2236_p13, %p2235_p7 }
  0x48   : > { %p2238_p6 = pnand %p2237_p2, %p2231_p3 }
  0x4a   : > { %2241 = shalt.err (!%p2238_p6)
}
  0x4b   : > { %s2332_s27 = smov 256   ;;  %s2333_s7 = smov 16  }
  0x4c   : > { %2113 = dma.hbm_to_vmem [thread:$0]  (!%p2939_p8), %s2474_s18, 2048, %s2481_s22, %s2483_s5, %s2332_s27, %s2332_s27, %s2333_s7  }
  0x4d   : > { %p2940_p12 = scmp.ne.s32.totalorder %s2934_s26, 0 }
  0x4e   : > { %s2514_s9 = sand.u32 (!%p2940_p12), 1, %s2312_s13   ;;  %p2941_p4 = scmp.ne.s32.totalorder (!%p2940_p12), %s2931_s23, 0 }
  0x4f   : > { %185 = sbr.rel (%p2940_p12) target bundleno = 943 (0x3af), region = 32  ;;  %s2072_s8 = sshll.u32 (!%p2940_p12), %s2514_s9, 7 }
  0x50   : > { %s188_s10 = scalar_lea.sflag (!%p2940_p12), [#allocation5], %s2514_s9  ;;  %s2518_s30 = scalar_lea.vmem (!%p2940_p12), [#allocation4], %s2072_s8 }
  0x56   : > { %2295 = dma.done.wait (%p2941_p4), %s188_s10, 2048  }
  0x57   : > { %2297 = vsyncadd (%p2941_p4), %s188_s10, 4294965248  ;;  %p2942_p8 = scmp.ne.s32.totalorder %s2929_s21, 0 }
  0x59   : > { %2299 = dma.done.wait (%p2942_p8), [#allocation8], 64  }
  0x5a   : > { %2301 = vsyncadd (%p2942_p8), [#allocation8], 4294967232  ;;  %v225_v0 = vld [vmem:[%s2518_s30] sm:$0xff]  ;;  %v226_v1 = vld [vmem:[%s2518_s30 + $0x8] sm:$0xff]  ;;  %v2334_v30 = vmov 0   ;;  %v274_v33 = vlaneseq  ;;  %vm222_vm0 = vcmask 516096  }
  0x5b   : > { %v229_v2 = vld [vmem:[%s2518_s30 + $0x20] sm:$0xff]  ;;  %v242_v3 = vadd.f32 %v226_v1, %v225_v0  ;;  %v230_v4 = vld [vmem:[%s2518_s30 + $0x28] sm:$0xff]  ;;  %v227_v5 = vld [vmem:[%s2518_s30 + $0x10] sm:$0xff]  ;;  %v1020_v12 = vmax.f32 %v225_v0, %v226_v1  ;;  %2178 = vset.pattern.permute.xlu0 %v2334_v30  ;;  %2179 = vset.pattern.permute.xlu1 %v2334_v30  ;;  %v2335_v34 = vmov 1966171168   ;;  %vm1795_vm1 = vcmask 523264  }
  0x5c   : > { %v228_v6 = vld [vmem:[%s2518_s30 + $0x18] sm:$0xff]  ;;  %v248_v7 = vadd.f32 %v230_v4, %v229_v2  ;;  %v231_v8 = vld [vmem:[%s2518_s30 + $0x30] sm:$0xff]  ;;  %v233_v14 = vld [vmem:[%s2518_s30 + $0x40] sm:$0xff]  ;;  %v1026_v17 = vmax.f32 %v229_v2, %v230_v4  ;;  %v535_v35 = vunpack.c.l.s4 %v2335_v34  ;;  %v2545_v36 = vshrl.u32 %v274_v33, 7  ;;  %s2080_s26 = sshll.u32 %s2320_s15, 4  ;;  %s216_s29 = scalar_lea.vmem [#allocation9], %s2514_s9 }
  0x5d   : > { %v232_v9 = vld [vmem:[%s2518_s30 + $0x38] sm:$0xff]  ;;  %243 = vadd.xlane.f32.xlu0 %v242_v3  ;;  %v245_v10 = vadd.f32 %v228_v6, %v227_v5  ;;  %v1023_v13 = vmax.f32 %v227_v5, %v228_v6  ;;  %v234_v15 = vld [vmem:[%s2518_s30 + $0x48] sm:$0xff]  ;;  %v235_v18 = vld [vmem:[%s2518_s30 + $0x50] sm:$0xff]  ;;  %vm2338_vm2 = vmmov 0   ;;  %vm957_vm3 = vcmask 130112   ;;  %s1976_s18 = sshll.u32 %s216_s29, 4  ;;  %s2869_s20 = scalar_lea.hbm %s2922_s3, %s2080_s26  ;;  %s2871_s18 = int_to_ptr.vmem [resolvable:$true] %s1976_s18 }
  0x5e   : > { %249 = vadd.xlane.f32.xlu1 %v248_v7  ;;  %v251_v11 = vadd.f32 %v232_v9, %v231_v8  ;;  %v254_v16 = vadd.f32 %v234_v15, %v233_v14  ;;  %v236_v19 = vld [vmem:[%s2518_s30 + $0x58] sm:$0xff]  ;;  %v1029_v21 = vmax.f32 %v231_v8, %v232_v9  ;;  %v237_v22 = vld [vmem:[%s2518_s30 + $0x60] sm:$0xff]  ;;  %v238_v23 = vld [vmem:[%s2518_s30 + $0x68] sm:$0xff]  ;;  %v1032_v25 = vmax.f32 %v233_v14, %v234_v15  ;;  %s1964_s6 = scalar_lea.sflag [#allocation6], %s2514_s9  ;;  %s2242_s11 = scalar_lea.vmem %s2871_s18, 16 }
  0x5f   : > { %v257_v20 = vadd.f32 %v236_v19, %v235_v18  ;;  %v260_v24 = vadd.f32 %v238_v23, %v237_v22  ;;  %v239_v26 = vld [vmem:[%s2518_s30 + $0x70] sm:$0xff]  ;;  %v240_v27 = vld [vmem:[%s2518_s30 + $0x78] sm:$0xff]  ;;  %v1035_v29 = vmax.f32 %v235_v18, %v236_v19  ;;  %v1038_v31 = vmax.f32 %v237_v22, %v238_v23  ;;  %p2243_p5 = scmp.ne.s32.totalorder %s2871_s18, %s2242_s11  ;;  %p2943_p10 = scmp.ne.s32.totalorder %s2932_s24, 0 }
  0x60   : > { %v263_v28 = vadd.f32 %v240_v27, %v239_v26  ;;  %v1041_v32 = vmax.f32 %v239_v26, %v240_v27  ;;  %v536_v37 = vunpack.c.0.s8 %v535_v35  ;;  %v2548_v38 = vsub.s32 0, %v2545_v36  ;;  %s2339_s15 = smov [#allocation9]  }
  0x61   : > { %246 = vadd.xlane.f32.xlu0 %v245_v10  ;;  %v2551_v39 = vsub.s32 1, %v2545_v36  ;;  %v2554_v40 = vsub.s32 2, %v2545_v36  ;;  %v2557_v41 = vsub.s32 3, %v2545_v36  ;;  %v2560_v42 = vsub.s32 4, %v2545_v36  ;;  %p2244_p11 = pnand %p2243_p5, %p2943_p10  ;;  %s2246_s19 = sshll.u32 %s2339_s15, 4  ;;  %s2247_s19 = int_to_ptr.vmem [resolvable:$false] %s2246_s19 }
  0x62   : > { %252 = vadd.xlane.f32.xlu1 %v251_v11  ;;  %v2563_v43 = vsub.s32 5, %v2545_v36  ;;  %v2566_v44 = vsub.s32 6, %v2545_v36  ;;  %v2569_v45 = vsub.s32 7, %v2545_v36  ;;  %v2572_v47 = vsub.s32 %v536_v37, %v2545_v36  ;;  %s2248_s27 = scalar_lea.vmem %s2247_s19, 32  ;;  %p2249_p0 = scmp.lt.s32.totalorder %s2871_s18, %s2247_s19 }
  0x63   : > { %vm964_vm4 = vcmask 195712   ;;  %vm971_vm5 = vcmask 261312   ;;  %vm978_vm6 = vcmask 326912   ;;  %vm985_vm7 = vcmask 392512   ;;  %p2245_p1 = pneg %p2244_p11  ;;  %p2250_p9 = scmp.lt.s32.totalorder %s2248_s27, %s2242_s11 }
  0x64   : > { %vm992_vm8 = vcmask 458112   ;;  %vm999_vm9 = vcmask 523712   ;;  %vm1792_vm10 = vcmask 1040384   ;;  %vm1878_vm11 = vcmask 1043456  }
  0x65   : > { %1021 = vmax.xlane.f32.xlu0 %v1020_v12  ;;  %vm1874_vm12 = vcmask 31744   ;;  %p2251_p3 = por %p2250_p9, %p2249_p0 }
  0x66   : > { %1024 = vmax.xlane.f32.xlu1 %v1023_v13 }
  0x67   : > { %p2252_p7 = pnand %p2251_p3, %p2245_p1 }
  0x69   : > { %255 = vadd.xlane.f32.xlu0 %v254_v16 }
  0x6a   : > { %1027 = vmax.xlane.f32.xlu1 %v1026_v17 }
  0x6d   : > { %258 = vadd.xlane.f32.xlu0 %v257_v20 }
  0x6e   : > { %1030 = vmax.xlane.f32.xlu1 %v1029_v21 }
  0x71   : > { %261 = vadd.xlane.f32.xlu0 %v260_v24 }
  0x72   : > { %1033 = vmax.xlane.f32.xlu1 %v1032_v25 }
  0x75   : > { %264 = vadd.xlane.f32.xlu0 %v263_v28 }
  0x76   : > { %1036 = vmax.xlane.f32.xlu1 %v1035_v29 }
  0x79   : > { %1039 = vmax.xlane.f32.xlu0 %v1038_v31 }
  0x7a   : > { %1042 = vmax.xlane.f32.xlu1 %v1041_v32 }
  0xea   : > { %v244_v46 = vpop.xlane.xlu0 %243 }
  0xeb   : > { %v250_v48 = vpop.xlane.xlu1 %249  ;;  %v277_v49 = vrot.slane %v244_v46, %v2548_v38  ;;  %v281_v50 = vrot.slane %v244_v46, %v2551_v39  ;;  %v285_v51 = vrot.slane %v244_v46, %v2554_v40  ;;  %v289_v52 = vrot.slane %v244_v46, %v2557_v41 }
  0xec   : > { %v293_v53 = vrot.slane %v244_v46, %v2560_v42  ;;  %v297_v54 = vrot.slane %v244_v46, %v2563_v43  ;;  %v301_v55 = vrot.slane %v244_v46, %v2566_v44  ;;  %v305_v56 = vrot.slane %v244_v46, %v2569_v45 }
  0xed   : > { %v530_v57 = vcombine.low %v277_v49, %v281_v50  ;;  %v531_v58 = vcombine.low %v285_v51, %v289_v52  ;;  %v341_v59 = vrot.slane %v250_v48, %v2548_v38  ;;  %v345_v60 = vrot.slane %v250_v48, %v2551_v39 }
  0xee   : > { %v247_v61 = vpop.xlane.xlu0 %246  ;;  %v532_v62 = vcombine.low %v293_v53, %v297_v54  ;;  %v533_v63 = vcombine.low %v301_v55, %v305_v56  ;;  %v349_v0 = vrot.slane %v250_v48, %v2554_v40  ;;  %v353_v1 = vrot.slane %v250_v48, %v2557_v41 }
  0xef   : > { %v2586_v2 = vpop.xlane.xlu1 %252  ;;  %v540_v3 = vrot.slane %v530_v57, %v2572_v47  ;;  %v547_v4 = vrot.slane %v531_v58, %v2572_v47  ;;  %v309_v5 = vrot.slane %v247_v61, %v2548_v38  ;;  %v313_v6 = vrot.slane %v247_v61, %v2551_v39 }
  0xf0   : > { %v554_v7 = vrot.slane %v532_v62, %v2572_v47  ;;  %v561_v8 = vrot.slane %v533_v63, %v2572_v47  ;;  %v317_v9 = vrot.slane %v247_v61, %v2554_v40  ;;  %v321_v10 = vrot.slane %v247_v61, %v2557_v41 }
  0xf1   : > { %v562_v11 = vcombine.low %v540_v3, %v547_v4  ;;  %v325_v12 = vrot.slane %v247_v61, %v2560_v42  ;;  %v329_v13 = vrot.slane %v247_v61, %v2563_v43  ;;  %v333_v14 = vrot.slane %v247_v61, %v2566_v44 }
  0xf2   : > { %v563_v15 = vcombine.low %v554_v7, %v561_v8  ;;  %v337_v16 = vrot.slane %v247_v61, %v2569_v45  ;;  %v579_v17 = vcombine.low %v309_v5, %v313_v6  ;;  %v580_v18 = vcombine.low %v317_v9, %v321_v10 }
  0xf3   : > { %v2600_v19 = vpop.xlane.xlu1 %1024  ;;  %v570_v20 = vrot.slane %v562_v11, %v2572_v47  ;;  %v581_v21 = vcombine.low %v325_v12, %v329_v13  ;;  %v357_v22 = vrot.slane %v250_v48, %v2560_v42  ;;  %v361_v23 = vrot.slane %v250_v48, %v2563_v43 }
  0xf4   : > { %v577_v24 = vrot.slane %v563_v15, %v2572_v47  ;;  %v582_v25 = vcombine.low %v333_v14, %v337_v16  ;;  %v589_v26 = vrot.slane %v579_v17, %v2572_v47  ;;  %v596_v27 = vrot.slane %v580_v18, %v2572_v47 }
  0xf5   : > { %v603_v28 = vrot.slane %v581_v21, %v2572_v47  ;;  %v365_v29 = vrot.slane %v250_v48, %v2566_v44  ;;  %v369_v30 = vrot.slane %v250_v48, %v2569_v45  ;;  %v628_v31 = vcombine.low %v341_v59, %v345_v60  ;;  %v1022_v60 = vpop.xlane.xlu0 %1021 }
  0xf6   : > { %v578_v32 = vcombine.low %v570_v20, %v577_v24  ;;  %v610_v34 = vrot.slane %v582_v25, %v2572_v47  ;;  %v611_v35 = vcombine.low %v589_v26, %v596_v27  ;;  %v629_v37 = vcombine.low %v349_v0, %v353_v1 }
  0xf7   : > { %v630_v46 = vcombine.low %v357_v22, %v361_v23  ;;  %v631_v49 = vcombine.low %v365_v29, %v369_v30  ;;  %v638_v50 = vrot.slane %v628_v31, %v2572_v47  ;;  %v373_v51 = vrot.slane %v2586_v2, %v2548_v38  ;;  %v2615_v52 = vpop.xlane.xlu1 %1027 }
  0xf8   : > { %923 = vperm.xlu0 %2178, %v578_v32   ;;  %v612_v53 = vcombine.low %v603_v28, %v610_v34  ;;  %v619_v54 = vrot.slane %v611_v35, %v2572_v47  ;;  %v645_v48 = vrot.slane %v629_v37, %v2572_v47  ;;  %v377_v55 = vrot.slane %v2586_v2, %v2551_v39 }
  0xf9   : > { %v652_v56 = vrot.slane %v630_v46, %v2572_v47  ;;  %v659_v57 = vrot.slane %v631_v49, %v2572_v47  ;;  %v381_v58 = vrot.slane %v2586_v2, %v2554_v40  ;;  %v385_v59 = vrot.slane %v2586_v2, %v2557_v41 }
  0xfa   : > { %v626_v61 = vrot.slane %v612_v53, %v2572_v47  ;;  %v660_v62 = vcombine.low %v638_v50, %v645_v48  ;;  %v389_v63 = vrot.slane %v2586_v2, %v2560_v42  ;;  %v393_v0 = vrot.slane %v2586_v2, %v2563_v43 }
  0xfb   : > { %v661_v1 = vcombine.low %v652_v56, %v659_v57  ;;  %v397_v3 = vrot.slane %v2586_v2, %v2566_v44  ;;  %v401_v4 = vrot.slane %v2586_v2, %v2569_v45  ;;  %v677_v5 = vcombine.low %v373_v51, %v377_v55  ;;  %v1031_v14 = vpop.xlane.xlu1 %1030 }
  0xfc   : > { %v627_v6 = vcombine.low %v619_v54, %v626_v61  ;;  %v668_v7 = vrot.slane %v660_v62, %v2572_v47  ;;  %v678_v8 = vcombine.low %v381_v58, %v385_v59  ;;  %v679_v9 = vcombine.low %v389_v63, %v393_v0 }
  0xfd   : > { %v675_v10 = vrot.slane %v661_v1, %v2572_v47  ;;  %v680_v11 = vcombine.low %v397_v3, %v401_v4  ;;  %v687_v12 = vrot.slane %v677_v5, %v2572_v47  ;;  %v1055_v13 = vrot.slane %v1022_v60, %v2548_v38 }
  0xfe   : > { %926 = vperm.xlu1 %2179, %v627_v6   ;;  %v694_v15 = vrot.slane %v678_v8, %v2572_v47  ;;  %v701_v16 = vrot.slane %v679_v9, %v2572_v47  ;;  %v1059_v2 = vrot.slane %v1022_v60, %v2551_v39  ;;  %v1063_v17 = vrot.slane %v1022_v60, %v2554_v40 }
  0xff   : > { %v676_v18 = vcombine.low %v668_v7, %v675_v10  ;;  %v708_v20 = vrot.slane %v680_v11, %v2572_v47  ;;  %v1067_v21 = vrot.slane %v1022_v60, %v2557_v41  ;;  %v1071_v22 = vrot.slane %v1022_v60, %v2560_v42  ;;  %v1034_v8 = vpop.xlane.xlu1 %1033 }
 0x100   : > { %v709_v23 = vcombine.low %v687_v12, %v694_v15  ;;  %v1075_v24 = vrot.slane %v1022_v60, %v2563_v43  ;;  %v1079_v25 = vrot.slane %v1022_v60, %v2566_v44  ;;  %v1083_v26 = vrot.slane %v1022_v60, %v2569_v45 }
 0x101   : > { %v710_v27 = vcombine.low %v701_v16, %v708_v20  ;;  %v1308_v28 = vcombine.low %v1055_v13, %v1059_v2  ;;  %v1309_v29 = vcombine.low %v1063_v17, %v1067_v21  ;;  %v1151_v30 = vrot.slane %v1031_v14, %v2548_v38 }
 0x102   : > { %929 = vperm.xlu1 %2179, %v676_v18   ;;  %v717_v31 = vrot.slane %v709_v23, %v2572_v47  ;;  %v1310_v32 = vcombine.low %v1071_v22, %v1075_v24  ;;  %v1311_v34 = vcombine.low %v1079_v25, %v1083_v26  ;;  %v1155_v35 = vrot.slane %v1031_v14, %v2551_v39 }
 0x103   : > { %v724_v37 = vrot.slane %v710_v27, %v2572_v47  ;;  %v1318_v46 = vrot.slane %v1308_v28, %v2572_v47  ;;  %v1325_v49 = vrot.slane %v1309_v29, %v2572_v47  ;;  %v1159_v50 = vrot.slane %v1031_v14, %v2554_v40 }
 0x104   : > { %v1332_v51 = vrot.slane %v1310_v32, %v2572_v47  ;;  %v1339_v53 = vrot.slane %v1311_v34, %v2572_v47  ;;  %v1163_v54 = vrot.slane %v1031_v14, %v2557_v41  ;;  %v1167_v48 = vrot.slane %v1031_v14, %v2560_v42  ;;  %v256_v32 = vpop.xlane.xlu0 %255 }
 0x105   : > { %v725_v55 = vcombine.low %v717_v31, %v724_v37  ;;  %v1340_v56 = vcombine.low %v1318_v46, %v1325_v49  ;;  %v1171_v57 = vrot.slane %v1031_v14, %v2563_v43  ;;  %v1175_v58 = vrot.slane %v1031_v14, %v2566_v44 }
 0x106   : > { %v1341_v59 = vcombine.low %v1332_v51, %v1339_v53  ;;  %v1179_v60 = vrot.slane %v1031_v14, %v2569_v45  ;;  %v1455_v61 = vcombine.low %v1151_v30, %v1155_v35  ;;  %v1456_v62 = vcombine.low %v1159_v50, %v1163_v54 }
 0x107   : > { %932 = vperm.xlu1 %2179, %v725_v55   ;;  %v1348_v63 = vrot.slane %v1340_v56, %v2572_v47  ;;  %v1457_v0 = vcombine.low %v1167_v48, %v1171_v57  ;;  %v1087_v1 = vrot.slane %v2600_v19, %v2548_v38  ;;  %v1091_v3 = vrot.slane %v2600_v19, %v2551_v39 }
 0x108   : > { %v1355_v4 = vrot.slane %v1341_v59, %v2572_v47  ;;  %v1458_v5 = vcombine.low %v1175_v58, %v1179_v60  ;;  %v1465_v6 = vrot.slane %v1455_v61, %v2572_v47  ;;  %v1472_v7 = vrot.slane %v1456_v62, %v2572_v47 }
 0x109   : > { %v1479_v9 = vrot.slane %v1457_v0, %v2572_v47  ;;  %v1095_v10 = vrot.slane %v2600_v19, %v2554_v40  ;;  %v1099_v11 = vrot.slane %v2600_v19, %v2557_v41  ;;  %v1103_v12 = vrot.slane %v2600_v19, %v2560_v42 }
 0x10a   : > { %v1356_v13 = vcombine.low %v1348_v63, %v1355_v4  ;;  %v1486_v14 = vrot.slane %v1458_v5, %v2572_v47  ;;  %v1487_v15 = vcombine.low %v1465_v6, %v1472_v7  ;;  %v1107_v16 = vrot.slane %v2600_v19, %v2563_v43 }
 0x10b   : > { %v1111_v2 = vrot.slane %v2600_v19, %v2566_v44  ;;  %v1115_v17 = vrot.slane %v2600_v19, %v2569_v45  ;;  %v1357_v18 = vcombine.low %v1087_v1, %v1091_v3  ;;  %v1358_v20 = vcombine.low %v1095_v10, %v1099_v11  ;;  %v1037_v1 = vpop.xlane.xlu1 %1036 }
 0x10c   : > { %1701 = vperm.xlu1 %2179, %v1356_v13   ;;  %v1488_v21 = vcombine.low %v1479_v9, %v1486_v14  ;;  %v1495_v22 = vrot.slane %v1487_v15, %v2572_v47  ;;  %v1359_v23 = vcombine.low %v1103_v12, %v1107_v16  ;;  %v1183_v24 = vrot.slane %v1034_v8, %v2548_v38 }
 0x10d   : > { %v1360_v25 = vcombine.low %v1111_v2, %v1115_v17  ;;  %v1367_v26 = vrot.slane %v1357_v18, %v2572_v47  ;;  %v1374_v27 = vrot.slane %v1358_v20, %v2572_v47  ;;  %v1187_v28 = vrot.slane %v1034_v8, %v2551_v39 }
 0x10e   : > { %v1502_v29 = vrot.slane %v1488_v21, %v2572_v47  ;;  %v1381_v19 = vrot.slane %v1359_v23, %v2572_v47  ;;  %v1191_v30 = vrot.slane %v1034_v8, %v2554_v40  ;;  %v1195_v31 = vrot.slane %v1034_v8, %v2557_v41 }
 0x10f   : > { %v1388_v34 = vrot.slane %v1360_v25, %v2572_v47  ;;  %v1389_v35 = vcombine.low %v1367_v26, %v1374_v27  ;;  %v1199_v37 = vrot.slane %v1034_v8, %v2560_v42  ;;  %v1203_v46 = vrot.slane %v1034_v8, %v2563_v43 }
 0x110   : > { %v1503_v49 = vcombine.low %v1495_v22, %v1502_v29  ;;  %v1207_v50 = vrot.slane %v1034_v8, %v2566_v44  ;;  %v1211_v51 = vrot.slane %v1034_v8, %v2569_v45  ;;  %v1504_v53 = vcombine.low %v1183_v24, %v1187_v28 }
 0x111   : > { %v1390_v54 = vcombine.low %v1381_v19, %v1388_v34  ;;  %v1397_v48 = vrot.slane %v1389_v35, %v2572_v47  ;;  %v1505_v55 = vcombine.low %v1191_v30, %v1195_v31  ;;  %v1506_v56 = vcombine.low %v1199_v37, %v1203_v46 }
 0x112   : > { %1710 = vperm.xlu0 %2178, %v1503_v49   ;;  %v1507_v57 = vcombine.low %v1207_v50, %v1211_v51  ;;  %v1514_v58 = vrot.slane %v1504_v53, %v2572_v47  ;;  %v405_v59 = vrot.slane %v256_v32, %v2548_v38  ;;  %v409_v60 = vrot.slane %v256_v32, %v2551_v39 }
 0x113   : > { %v1404_v61 = vrot.slane %v1390_v54, %v2572_v47  ;;  %v1521_v62 = vrot.slane %v1505_v55, %v2572_v47  ;;  %v1528_v63 = vrot.slane %v1506_v56, %v2572_v47  ;;  %v413_v0 = vrot.slane %v256_v32, %v2554_v40 }
 0x114   : > { %v1535_v3 = vrot.slane %v1507_v57, %v2572_v47  ;;  %v417_v4 = vrot.slane %v256_v32, %v2557_v41  ;;  %v421_v5 = vrot.slane %v256_v32, %v2560_v42  ;;  %v425_v6 = vrot.slane %v256_v32, %v2563_v43 }
 0x115   : > { %v1405_v7 = vcombine.low %v1397_v48, %v1404_v61  ;;  %v1536_v8 = vcombine.low %v1514_v58, %v1521_v62  ;;  %v429_v9 = vrot.slane %v256_v32, %v2566_v44  ;;  %v433_v10 = vrot.slane %v256_v32, %v2569_v45  ;;  %v1043_v48 = vpop.xlane.xlu1 %1042 }
 0x116   : > { %v1537_v11 = vcombine.low %v1528_v63, %v1535_v3  ;;  %v726_v12 = vcombine.low %v405_v59, %v409_v60  ;;  %v727_v13 = vcombine.low %v413_v0, %v417_v4  ;;  %v728_v14 = vcombine.low %v421_v5, %v425_v6  ;;  %v259_v4 = vpop.xlane.xlu0 %258 }
 0x117   : > { %1704 = vperm.xlu1 %2179, %v1405_v7   ;;  %v1544_v15 = vrot.slane %v1536_v8, %v2572_v47  ;;  %v729_v16 = vcombine.low %v429_v9, %v433_v10  ;;  %v1215_v2 = vrot.slane %v1037_v1, %v2548_v38  ;;  %v1219_v17 = vrot.slane %v1037_v1, %v2551_v39 }
 0x118   : > { %v1551_v18 = vrot.slane %v1537_v11, %v2572_v47  ;;  %v736_v20 = vrot.slane %v726_v12, %v2572_v47  ;;  %v743_v21 = vrot.slane %v727_v13, %v2572_v47  ;;  %v750_v22 = vrot.slane %v728_v14, %v2572_v47 }
 0x119   : > { %v757_v23 = vrot.slane %v729_v16, %v2572_v47  ;;  %v1223_v24 = vrot.slane %v1037_v1, %v2554_v40  ;;  %v1227_v25 = vrot.slane %v1037_v1, %v2557_v41  ;;  %v1231_v26 = vrot.slane %v1037_v1, %v2560_v42 }
 0x11a   : > { %v1552_v27 = vcombine.low %v1544_v15, %v1551_v18  ;;  %v758_v28 = vcombine.low %v736_v20, %v743_v21  ;;  %v1235_v29 = vrot.slane %v1037_v1, %v2563_v43  ;;  %v1239_v19 = vrot.slane %v1037_v1, %v2566_v44 }
 0x11b   : > { %v759_v30 = vcombine.low %v750_v22, %v757_v23  ;;  %v1243_v31 = vrot.slane %v1037_v1, %v2569_v45  ;;  %v1553_v32 = vcombine.low %v1215_v2, %v1219_v17  ;;  %v1554_v34 = vcombine.low %v1223_v24, %v1227_v25 }
 0x11c   : > { %1713 = vperm.xlu0 %2178, %v1552_v27   ;;  %v766_v35 = vrot.slane %v758_v28, %v2572_v47  ;;  %v1555_v37 = vcombine.low %v1231_v26, %v1235_v29  ;;  %v1119_v46 = vrot.slane %v2615_v52, %v2548_v38  ;;  %v1123_v49 = vrot.slane %v2615_v52, %v2551_v39  ;;  %v262_v28 = vpop.xlane.xlu0 %261 }
 0x11d   : > { %v773_v50 = vrot.slane %v759_v30, %v2572_v47  ;;  %v1556_v51 = vcombine.low %v1239_v19, %v1243_v31  ;;  %v1563_v53 = vrot.slane %v1553_v32, %v2572_v47  ;;  %v1570_v54 = vrot.slane %v1554_v34, %v2572_v47 }
 0x11e   : > { %v1577_v55 = vrot.slane %v1555_v37, %v2572_v47  ;;  %v1127_v56 = vrot.slane %v2615_v52, %v2554_v40  ;;  %v1131_v57 = vrot.slane %v2615_v52, %v2557_v41  ;;  %v1135_v58 = vrot.slane %v2615_v52, %v2560_v42 }
 0x11f   : > { %v774_v59 = vcombine.low %v766_v35, %v773_v50  ;;  %v1584_v60 = vrot.slane %v1556_v51, %v2572_v47  ;;  %v1585_v61 = vcombine.low %v1563_v53, %v1570_v54  ;;  %v1139_v62 = vrot.slane %v2615_v52, %v2563_v43 }
 0x120   : > { %v1143_v63 = vrot.slane %v2615_v52, %v2566_v44  ;;  %v1147_v0 = vrot.slane %v2615_v52, %v2569_v45  ;;  %v1406_v1 = vcombine.low %v1119_v46, %v1123_v49  ;;  %v1407_v3 = vcombine.low %v1127_v56, %v1131_v57 }
 0x121   : > { %935 = vperm.xlu1 %2179, %v774_v59   ;;  %v1586_v5 = vcombine.low %v1577_v55, %v1584_v60  ;;  %v1593_v6 = vrot.slane %v1585_v61, %v2572_v47  ;;  %v1408_v7 = vcombine.low %v1135_v58, %v1139_v62  ;;  %v1279_v8 = vrot.slane %v1043_v48, %v2548_v38 }
 0x122   : > { %v1409_v9 = vcombine.low %v1143_v63, %v1147_v0  ;;  %v1416_v10 = vrot.slane %v1406_v1, %v2572_v47  ;;  %v1423_v11 = vrot.slane %v1407_v3, %v2572_v47  ;;  %v1283_v12 = vrot.slane %v1043_v48, %v2551_v39  ;;  %v265_v0 = vpop.xlane.xlu0 %264 }
 0x123   : > { %v1600_v13 = vrot.slane %v1586_v5, %v2572_v47  ;;  %v1430_v52 = vrot.slane %v1408_v7, %v2572_v47  ;;  %v1287_v14 = vrot.slane %v1043_v48, %v2554_v40  ;;  %v1291_v15 = vrot.slane %v1043_v48, %v2557_v41 }
 0x124   : > { %v1437_v16 = vrot.slane %v1409_v9, %v2572_v47  ;;  %v1438_v2 = vcombine.low %v1416_v10, %v1423_v11  ;;  %v1295_v17 = vrot.slane %v1043_v48, %v2560_v42  ;;  %v1299_v18 = vrot.slane %v1043_v48, %v2563_v43 }
 0x125   : > { %v1601_v20 = vcombine.low %v1593_v6, %v1600_v13  ;;  %v1303_v21 = vrot.slane %v1043_v48, %v2566_v44  ;;  %v1307_v22 = vrot.slane %v1043_v48, %v2569_v45  ;;  %v1651_v23 = vcombine.low %v1279_v8, %v1283_v12 }
 0x126   : > { %v1439_v24 = vcombine.low %v1430_v52, %v1437_v16  ;;  %v1446_v25 = vrot.slane %v1438_v2, %v2572_v47  ;;  %v1652_v26 = vcombine.low %v1287_v14, %v1291_v15  ;;  %v1653_v27 = vcombine.low %v1295_v17, %v1299_v18 }
 0x127   : > { %1716 = vperm.xlu0 %2178, %v1601_v20   ;;  %v1654_v29 = vcombine.low %v1303_v21, %v1307_v22  ;;  %v1661_v19 = vrot.slane %v1651_v23, %v2572_v47  ;;  %v437_v30 = vrot.slane %v259_v4, %v2548_v38  ;;  %v441_v31 = vrot.slane %v259_v4, %v2551_v39 }
 0x128   : > { %v1453_v32 = vrot.slane %v1439_v24, %v2572_v47  ;;  %v1668_v34 = vrot.slane %v1652_v26, %v2572_v47  ;;  %v1675_v35 = vrot.slane %v1653_v27, %v2572_v47  ;;  %v445_v37 = vrot.slane %v259_v4, %v2554_v40 }
 0x129   : > { %v1682_v46 = vrot.slane %v1654_v29, %v2572_v47  ;;  %v449_v49 = vrot.slane %v259_v4, %v2557_v41  ;;  %v453_v50 = vrot.slane %v259_v4, %v2560_v42  ;;  %v457_v51 = vrot.slane %v259_v4, %v2563_v43 }
 0x12a   : > { %v1454_v53 = vcombine.low %v1446_v25, %v1453_v32  ;;  %v1683_v54 = vcombine.low %v1661_v19, %v1668_v34  ;;  %v461_v48 = vrot.slane %v259_v4, %v2566_v44  ;;  %v465_v55 = vrot.slane %v259_v4, %v2569_v45  ;;  %v1040_v25 = vpop.xlane.xlu0 %1039 }
 0x12b   : > { %v1684_v56 = vcombine.low %v1675_v35, %v1682_v46  ;;  %v775_v57 = vcombine.low %v437_v30, %v441_v31  ;;  %v776_v58 = vcombine.low %v445_v37, %v449_v49  ;;  %v777_v59 = vcombine.low %v453_v50, %v457_v51 }
 0x12c   : > { %1707 = vperm.xlu1 %2179, %v1454_v53   ;;  %v1691_v60 = vrot.slane %v1683_v54, %v2572_v47  ;;  %v778_v61 = vcombine.low %v461_v48, %v465_v55  ;;  %v469_v62 = vrot.slane %v262_v28, %v2548_v38  ;;  %v473_v63 = vrot.slane %v262_v28, %v2551_v39 }
 0x12d   : > { %v1698_v1 = vrot.slane %v1684_v56, %v2572_v47  ;;  %v785_v3 = vrot.slane %v775_v57, %v2572_v47  ;;  %v792_v5 = vrot.slane %v776_v58, %v2572_v47  ;;  %v799_v4 = vrot.slane %v777_v59, %v2572_v47 }
 0x12e   : > { %v806_v6 = vrot.slane %v778_v61, %v2572_v47  ;;  %v477_v7 = vrot.slane %v262_v28, %v2554_v40  ;;  %v481_v8 = vrot.slane %v262_v28, %v2557_v41  ;;  %v485_v9 = vrot.slane %v262_v28, %v2560_v42 }
 0x12f   : > { %v1699_v10 = vcombine.low %v1691_v60, %v1698_v1  ;;  %v807_v11 = vcombine.low %v785_v3, %v792_v5  ;;  %v489_v12 = vrot.slane %v262_v28, %v2563_v43  ;;  %v493_v13 = vrot.slane %v262_v28, %v2566_v44 }
 0x130   : > { %v808_v52 = vcombine.low %v799_v4, %v806_v6  ;;  %v497_v14 = vrot.slane %v262_v28, %v2569_v45  ;;  %v824_v15 = vcombine.low %v469_v62, %v473_v63  ;;  %v825_v16 = vcombine.low %v477_v7, %v481_v8 }
 0x131   : > { %1722 = vperm.xlu0 %2178, %v1699_v10   ;;  %v815_v2 = vrot.slane %v807_v11, %v2572_v47  ;;  %v826_v17 = vcombine.low %v485_v9, %v489_v12  ;;  %v501_v18 = vrot.slane %v265_v0, %v2548_v38  ;;  %v505_v20 = vrot.slane %v265_v0, %v2551_v39 }
 0x132   : > { %v822_v21 = vrot.slane %v808_v52, %v2572_v47  ;;  %v827_v22 = vcombine.low %v493_v13, %v497_v14  ;;  %v834_v23 = vrot.slane %v824_v15, %v2572_v47  ;;  %v841_v24 = vrot.slane %v825_v16, %v2572_v47  ;;  %v1794_v15 = vld [vmem:[#allocation7] sm:$0xf] }
 0x133   : > { %v848_v26 = vrot.slane %v826_v17, %v2572_v47  ;;  %v509_v27 = vrot.slane %v265_v0, %v2554_v40  ;;  %v513_v28 = vrot.slane %v265_v0, %v2557_v41  ;;  %v517_v29 = vrot.slane %v265_v0, %v2560_v42 }
 0x134   : > { %v823_v19 = vcombine.low %v815_v2, %v822_v21  ;;  %v855_v30 = vrot.slane %v827_v22, %v2572_v47  ;;  %v856_v31 = vcombine.low %v834_v23, %v841_v24  ;;  %v521_v32 = vrot.slane %v265_v0, %v2563_v43 }
 0x135   : > { %v525_v34 = vrot.slane %v265_v0, %v2566_v44  ;;  %v529_v35 = vrot.slane %v265_v0, %v2569_v45  ;;  %v873_v37 = vcombine.low %v501_v18, %v505_v20  ;;  %v874_v46 = vcombine.low %v509_v27, %v513_v28 }
 0x136   : > { %938 = vperm.xlu1 %2179, %v823_v19   ;;  %v857_v49 = vcombine.low %v848_v26, %v855_v30  ;;  %v864_v50 = vrot.slane %v856_v31, %v2572_v47  ;;  %v875_v51 = vcombine.low %v517_v29, %v521_v32  ;;  %v1247_v53 = vrot.slane %v1040_v25, %v2548_v38 }
 0x137   : > { %v876_v54 = vcombine.low %v525_v34, %v529_v35  ;;  %v883_v48 = vrot.slane %v873_v37, %v2572_v47  ;;  %v890_v55 = vrot.slane %v874_v46, %v2572_v47  ;;  %v1251_v56 = vrot.slane %v1040_v25, %v2551_v39 }
 0x138   : > { %v871_v57 = vrot.slane %v857_v49, %v2572_v47  ;;  %v897_v58 = vrot.slane %v875_v51, %v2572_v47  ;;  %v1255_v59 = vrot.slane %v1040_v25, %v2554_v40  ;;  %v1259_v60 = vrot.slane %v1040_v25, %v2557_v41 }
 0x139   : > { %v904_v61 = vrot.slane %v876_v54, %v2572_v47  ;;  %v905_v62 = vcombine.low %v883_v48, %v890_v55  ;;  %v1263_v38 = vrot.slane %v1040_v25, %v2560_v42  ;;  %v1267_v63 = vrot.slane %v1040_v25, %v2563_v43 }
 0x13a   : > { %v872_v0 = vcombine.low %v864_v50, %v871_v57  ;;  %v1271_v1 = vrot.slane %v1040_v25, %v2566_v44  ;;  %v1275_v39 = vrot.slane %v1040_v25, %v2569_v45  ;;  %v1602_v3 = vcombine.low %v1247_v53, %v1251_v56 }
 0x13b   : > { %v906_v5 = vcombine.low %v897_v58, %v904_v61  ;;  %v913_v4 = vrot.slane %v905_v62, %v2572_v47  ;;  %v1603_v6 = vcombine.low %v1255_v59, %v1259_v60  ;;  %v1604_v40 = vcombine.low %v1263_v38, %v1267_v63 }
 0x13c   : > { %941 = vperm.xlu1 %2179, %v872_v0   ;;  %v1605_v41 = vcombine.low %v1271_v1, %v1275_v39  ;;  %v1612_v7 = vrot.slane %v1602_v3, %v2572_v47  ;;  %v2336_v52 = vmov 0.0   ;;  %v2337_v14 = vmov -inf  }
 0x13d   : > { %v920_v8 = vrot.slane %v906_v5, %v2572_v47  ;;  %v1619_v42 = vrot.slane %v1603_v6, %v2572_v47  ;;  %v1626_v43 = vrot.slane %v1604_v40, %v2572_v47  ;;  %223 = vst.msk [vmem:[#allocation2] sm:$0x1] %vm222_vm0, %v2336_v52  ;;  %2088 = vmatprep.subr.mxu0 %v2336_v52  ;;  %224 = vst.msk [vmem:[#allocation3] sm:$0x1] %vm222_vm0, %v2337_v14 }
 0x13e   : > { %v1633_v44 = vrot.slane %v1605_v41, %v2572_v47  ;;  %2093 = vmatprep.subr.mxu1 %v2336_v52  ;;  %2089 = vmatpush3.xpose.msk.msra.mxu0 %vm1795_vm1, %v1794_v15  ;;  %v947_v23 = vand.u32 127, %v274_v33 }
 0x13f   : > { %v921_v9 = vcombine.low %v913_v4, %v920_v8  ;;  %v1634_v45 = vcombine.low %v1612_v7, %v1619_v42  ;;  %2090 = vmatprep.mubr.msk.f32.mxu0 %vm2338_vm2, %v2336_v52  ;;  %2095 = vmatprep.mubr.msk.f32.mxu1 %vm2338_vm2, %v2336_v52 }
 0x140   : > { %v1635_v10 = vcombine.low %v1626_v43, %v1633_v44  ;;  %v952_v25 = vadd.s32 4294967288, %v947_v23  ;;  %v959_v26 = vadd.s32 4294967280, %v947_v23  ;;  %v966_v28 = vadd.s32 4294967272, %v947_v23 }
 0x141   : > { %944 = vperm.xlu1 %2179, %v921_v9   ;;  %v1642_v11 = vrot.slane %v1634_v45, %v2572_v47  ;;  %v973_v29 = vadd.s32 4294967264, %v947_v23  ;;  %v987_v32 = vadd.s32 4294967248, %v947_v23  ;;  %v950_v34 = vsub.s32 %v947_v23, %v2545_v36 }
 0x142   : > { %v1649_v12 = vrot.slane %v1635_v10, %v2572_v47  ;;  %v955_v19 = vsub.s32 %v952_v25, %v2545_v36  ;;  %v962_v31 = vsub.s32 %v959_v26, %v2545_v36  ;;  %v969_v35 = vsub.s32 %v966_v28, %v2545_v36 }
 0x143   : > { %v980_v37 = vadd.s32 4294967256, %v947_v23  ;;  %v976_v46 = vsub.s32 %v973_v29, %v2545_v36  ;;  %v994_v54 = vadd.s32 4294967240, %v947_v23  ;;  %v990_v48 = vsub.s32 %v987_v32, %v2545_v36 }
 0x144   : > { %v1650_v13 = vcombine.low %v1642_v11, %v1649_v12  ;;  %v241_v12 = vld [vmem:[#allocation2] sm:$0x1] }
 0x145   : > { %v983_v58 = vsub.s32 %v980_v37, %v2545_v36  ;;  %v997_v4 = vsub.s32 %v994_v54, %v2545_v36 }
 0x146   : > { %1719 = vperm.xlu1 %2179, %v1650_v13  }
 0x177   : > { %v924_v22 = vpop.permute.xlu0 %923 }
 0x178   : > { %v951_v55 = vrot.slane %v924_v22, %v950_v34 }
 0x17d   : > { %v927_v16 = vpop.permute.xlu1 %926 }
 0x17e   : > { %v956_v49 = vrot.slane %v927_v16, %v955_v19 }
 0x180   : > { %v958_v61 = vsel %vm957_vm3, %v956_v49, %v951_v55 }
 0x181   : > { %v930_v2 = vpop.permute.xlu1 %929 }
 0x182   : > { %v963_v51 = vrot.slane %v930_v2, %v962_v31 }
 0x184   : > { %v965_v0 = vsel %vm964_vm4, %v963_v51, %v958_v61 }
 0x186   : > { %v933_v17 = vpop.permute.xlu1 %932 }
 0x187   : > { %v970_v56 = vrot.slane %v933_v17, %v969_v35 }
 0x189   : > { %v972_v5 = vsel %vm971_vm5, %v970_v56, %v965_v0 }
 0x18b   : > { %v1702_v18 = vpop.permute.xlu1 %1701 }
 0x18c   : > { %v1727_v57 = vrot.slane %v1702_v18, %v950_v34 }
 0x191   : > { %v1711_v27 = vpop.permute.xlu0 %1710 }
 0x192   : > { %v1741_v62 = vrot.slane %v1711_v27, %v969_v35  ;;  %v1873_v27 = vld [vmem:[%s2921_s2] sm:$0xf] }
 0x193   : > { %2094 = vmatpush3.msk.msra.mxu1 %vm1878_vm11, %v1873_v27 }
 0x196   : > { %v1705_v20 = vpop.permute.xlu1 %1704 }
 0x197   : > { %v1731_v50 = vrot.slane %v1705_v20, %v955_v19  ;;  %v1019_v20 = vld [vmem:[#allocation3] sm:$0x1] }
 0x199   : > { %v1732_v38 = vsel %vm957_vm3, %v1731_v50, %v1727_v57 }
 0x19b   : > { %v1714_v33 = vpop.permute.xlu0 %1713 }
 0x19c   : > { %v1746_v6 = vrot.slane %v1714_v33, %v976_v46 }
 0x1a0   : > { %v936_v21 = vpop.permute.xlu1 %935 }
 0x1a1   : > { %v977_v60 = vrot.slane %v936_v21, %v976_v46 }
 0x1a3   : > { %v979_v40 = vsel %vm978_vm6, %v977_v60, %v972_v5 }
 0x1a6   : > { %v1717_v1 = vpop.permute.xlu0 %1716 }
 0x1a7   : > { %v1751_v10 = vrot.slane %v1717_v1, %v983_v58 }
 0x1ab   : > { %v1708_v24 = vpop.permute.xlu1 %1707 }
 0x1ac   : > { %v1736_v53 = vrot.slane %v1708_v24, %v962_v31 }
 0x1ae   : > { %v1737_v39 = vsel %vm964_vm4, %v1736_v53, %v1732_v38 }
 0x1af   : > { %v1742_v7 = vsel %vm971_vm5, %v1741_v62, %v1737_v39 }
 0x1b0   : > { %v1723_v9 = vpop.permute.xlu0 %1722  ;;  %v1747_v36 = vsel %vm978_vm6, %v1746_v6, %v1742_v7 }
 0x1b1   : > { %v1761_v14 = vrot.slane %v1723_v9, %v997_v4  ;;  %v1752_v15 = vsel %vm985_vm7, %v1751_v10, %v1747_v36 }
 0x1b5   : > { %v939_v30 = vpop.permute.xlu1 %938 }
 0x1b6   : > { %v984_v63 = vrot.slane %v939_v30, %v983_v58 }
 0x1b8   : > { %v986_v8 = vsel %vm985_vm7, %v984_v63, %v979_v40 }
 0x1bb   : > { %v942_v59 = vpop.permute.xlu1 %941 }
 0x1bc   : > { %v991_v3 = vrot.slane %v942_v59, %v990_v48 }
 0x1be   : > { %v993_v43 = vsel %vm992_vm8, %v991_v3, %v986_v8 }
 0x1c0   : > { %v945_v41 = vpop.permute.xlu1 %944 }
 0x1c1   : > { %v998_v42 = vrot.slane %v945_v41, %v997_v4 }
 0x1c3   : > { %v1000_v44 = vsel %vm999_vm9, %v998_v42, %v993_v43 }
 0x1c4   : > { %v1007_v45 = vrot.slane %v1000_v44, %v2572_v47 }
 0x1c5   : > { %v1720_v11 = vpop.permute.xlu1 %1719 }
 0x1c6   : > { %v1014_v13 = vrot.slane %v1007_v45, %v2572_v47  ;;  %v1756_v52 = vrot.slane %v1720_v11, %v990_v48 }
 0x1c8   : > { %v1757_v16 = vsel %vm992_vm8, %v1756_v52, %v1752_v15  ;;  %v1016_v2 = vadd.f32 %v1014_v13, %v241_v12 }
 0x1c9   : > { %v1762_v17 = vsel %vm999_vm9, %v1761_v14, %v1757_v16 }
 0x1ca   : > { %v1769_v18 = vrot.slane %v1762_v17, %v2572_v47  ;;  %1018 = vst.msk [vmem:[#allocation2] sm:$0x1] %vm222_vm0, %v1016_v2 }
 0x1cc   : > { %v1776_v21 = vrot.slane %v1769_v18, %v2572_v47 }
 0x1ce   : > { %v1778_v22 = vmax.f32 %v1019_v20, %v1776_v21 }
 0x1d0   : > { %1779 = vst.msk [vmem:[#allocation3] sm:$0x1] %vm222_vm0, %v1778_v22 }
 0x1d1   : > { %v1783_v23 = vld [vmem:[#allocation2] sm:$0x1] }
 0x1d2   : > { %v1784_v24 = vmul.f32 0.00390625, %v1783_v23 }
 0x1d7   : > { %v2074_v25 = vld [vmem:[#allocation3] ss:$0 sm:$0xff] }
 0x1d8   : > { %v1793_v26 = vsel %vm1792_vm10, %v1784_v24, %v2074_v25 }
 0x1d9   : > { %2091 = vmatmul.mubr.msk.f32.vlgmr.msra.gmra.mrb[0].mxu0 %vm1795_vm1, %v1793_v26 }
 0x2ac   : > { %v1868_v28 = vpop.f32.mrb[0].mxu0 }
 0x2ad   : > { %v1872_v47 = vmax.f32 %v1868_v28, 0.0  ;;  %v2092_v29 = vpop.f32.mrb[1].mxu0 }
 0x2af   : > { %2096 = vmatmul.mubr.msk.f32.vlgmr.msra.gmra.mrb[0].mxu1 %vm1874_vm12, %v1872_v47 }
 0x382   : > { %v1948_v19 = vpop.f32.mrb[0].mxu1 }
 0x383   : > { %v1953_v30 = vrot.slane %v1948_v19, 1  ;;  %v2097_v31 = vpop.f32.mrb[1].mxu1 }
 0x385   : > { %v1955_v32 = vadd.f32 %v1953_v30, %v1948_v19 }
 0x387   : > { %v2079_v34 = vmul.f32 -1.442695, %v1955_v32 }
 0x389   : > { %2180 = vpow2.f32 %v2079_v34 }
 0x393   : > { %v2181_v35 = vpop.eup %2180 }
 0x394   : > { %v1959_v37 = vadd.f32 1.0, %v2181_v35 }
 0x396   : > { %2182 = vrcp.f32 %v1959_v37 }
 0x3a0   : > { %v2183_v46 = vpop.eup %2182 }
 0x3a1   : > { %1962 = vst.msk [vmem:[%s216_s29] sm:$0x1] %vm222_vm0, %v2183_v46 }
 0x3a2   : > { %2255 = shalt.err (!%p2252_p7)
}
 0x3a3   : > { %s2256_s7 = scalar_lea.hbm %s2869_s20, 16  ;;  %s2260_s10 = scalar_lea.hbm %s2922_s3, 32 }
 0x3a4   : > { %p2257_p13 = scmp.ne.s32.totalorder %s2869_s20, %s2256_s7  ;;  %p2261_p12 = scmp.lt.u32.totalorder %s2869_s20, %s2922_s3 }
 0x3a5   : > { %p2262_p4 = scmp.lt.u32.totalorder %s2260_s10, %s2256_s7  ;;  %p2264_p5 = scmp.lt.u32.totalorder %s2256_s7, %s2869_s20 }
 0x3a6   : > { %p2258_p2 = pnand %p2257_p13, %p2943_p10 }
 0x3a7   : > { %p2263_p8 = por %p2262_p4, %p2261_p12 }
 0x3a8   : > { %p2259_p6 = pneg %p2258_p2 }
 0x3a9   : > { %p2265_p11 = por %p2264_p5, %p2263_p8 }
 0x3ab   : > { %p2266_p1 = pnand %p2265_p11, %p2259_p6 }
 0x3ad   : > { %2269 = shalt.err (!%p2266_p1)
}
 0x3ae   : > { %2104 = dma.vmem_to_hbm [thread:$0]  (%p2943_p10), %s2871_s18, 16, %s2869_s20, %s1964_s6  }
 0x3af PF: > { %s1988_s23 = sand.u32 1, %s2308_s12   ;;  %p2944_p0 = scmp.ne.s32.totalorder %s2933_s25, 0 }
 0x3b0   : > { %p2945_p9 = scmp.ge.s32.totalorder %s2328_s17, 2  ;;  %s1989_s26 = scalar_lea.sflag [#allocation6], %s1988_s23 }
 0x3b2   : > { %p2115_p3 = pnand %p2945_p9, %p2944_p0 }
 0x3b4   : > { %2303 = dma.done.wait (!%p2115_p3), %s1989_s26, 16  }
 0x3b5   : > { %2305 = vsyncadd (!%p2115_p3), %s1989_s26, 4294967280  ;;  %s20_s17 = sadd.s32 1, %s2328_s17   ;;  %s2946_s12 = smov %s2312_s13 }
 0x3b6   : > { %p17_p7 = scmp.ge.s32.totalorder %s20_s17, 4   ;;  %s2947_s13 = smov %s2316_s14 }
 0x3b7   : > { %s2948_s14 = smov %s2479_s28  ;;  %s2949_s15 = smov %s2324_s16 }
 0x3b8   : > { %s2950_s16 = smov %s2952_s4  ;;  %19 = sbr.rel (!%p17_p7) target bundleno = 7 (0x7), region = 89 }
 0x3bf   :  { %1993 = vsyncpa [#allocation5], 1 }
 0x3c0   :  { %1995 = vsyncpa [#allocation5 + $0x1], 1 }
 0x3c1   :  { %1996 = vsyncpa [#allocation8], 1 }
 0x3c2   :  { %1997 = vsyncpa [#allocation6], 1 }
 0x3c3   :  { %1999 = vsyncpa [#allocation6 + $0x1], 1 }

</bundles_post_ra>
